<compile_context>
chip_gen: v5e
topology: v5e:2x2
jax: 0.10.0
libtpu: 0.0.40
codegen_flags: <defaults>
</compile_context>

<pallas_src>
import jax
import jax.numpy as jnp
from jax.experimental import pallas as pl
from jax.experimental.pallas import tpu as pltpu


def _round_up(n: int, m: int) -> int:
    return ((n + m - 1) // m) * m


def agent_net_kernel(x_ref, w1_ref, b1_ref, w2_ref, b2_ref, w3_ref, b3_ref,
                     out_ref):
    """Fused DQN forward for one batch tile.

    Matmul inputs are in the weight dtype (f32 or bf16); accumulation,
    bias-add and ReLU are f32; h1/h2 are carried in f32 between layers.
    """
    cdt = w1_ref.dtype  # compute dtype for MXU inputs

    x = x_ref[...].astype(cdt)

    # layer 1 + ReLU
    h1 = jnp.dot(x, w1_ref[...], preferred_element_type=jnp.float32)
    h1 = jnp.maximum(h1 + b1_ref[...], 0.0)

    # layer 2 + ReLU (cast only at the matmul input)
    h2 = jnp.dot(h1.astype(cdt), w2_ref[...], preferred_element_type=jnp.float32)
    h2 = jnp.maximum(h2 + b2_ref[...], 0.0)

    # layer 3 (no activation)
    q = jnp.dot(h2.astype(cdt), w3_ref[...], preferred_element_type=jnp.float32)
    out_ref[...] = (q + b3_ref[...]).astype(out_ref.dtype)


def prepare_params(params, compute_dtype=jnp.float32):
    """One-time parameter preparation (call once, reuse across forwards).

    Weights are cast to the MXU input dtype; biases stay f32 (they are added
    to the f32 accumulator inside the kernel).
    """
    w1, b1, w2, b2, w3, b3 = params
    f32 = jnp.float32
    return (w1.astype(compute_dtype), b1.astype(f32),
            w2.astype(compute_dtype), b2.astype(f32),
            w3.astype(compute_dtype), b3.astype(f32))


def agent_network_forward(state, prepared_params, *, block_batch=2048,
                          out_dtype=None):
    """Batch-tiled Pallas forward.

    `prepared_params` comes from `prepare_params()` (weights already in the
    compute dtype, biases f32).  Per call we only cast/pad `state` once.
    """
    w1, b1, w2, b2, w3, b3 = prepared_params
    compute_dtype = w1.dtype
    batch, state_dim = state.shape
    hidden_dim = w1.shape[1]
    action_dim = w3.shape[1]
    out_dtype = state.dtype if out_dtype is None else out_dtype

    # dtype-aware sublane packing: bf16 packs 16 rows per vreg, f32 packs 8.
    itemsize = jnp.dtype(compute_dtype).itemsize
    sub = 16 if itemsize == 2 else 8

    # Choose the number of batch tiles:
    #  * at least ceil(batch / block_batch)
    #  * at least 2 when the batch is big enough to split (lets
    #    dimension_semantics=("parallel",) use both TensorCores on v7x)
    # then pick tb ~ cdiv(batch, n_tiles) rounded to the sublane packing so
    # padding waste is < one sublane row.
    min_tiles = 2 if batch >= 2 * sub else 1
    n_tiles = max(min_tiles, pl.cdiv(batch, block_batch))
    tb = _round_up(pl.cdiv(batch, n_tiles), sub)
    b_pad = _round_up(batch, tb)
    grid = (b_pad // tb,)

    # Single cheap wrapper op: cast (and pad the batch axis if needed).
    x = state.astype(compute_dtype)
    if b_pad != batch:
        x = jnp.pad(x, ((0, b_pad - batch), (0, 0)))

    # Cost estimate for XLA's scheduler.
    out_itemsize = jnp.dtype(out_dtype).itemsize
    flops = 2 * b_pad * (state_dim * hidden_dim + hidden_dim * hidden_dim
                         + hidden_dim * action_dim)
    w_bytes = (state_dim * hidden_dim + hidden_dim * hidden_dim
               + hidden_dim * action_dim) * itemsize
    bytes_accessed = (b_pad * state_dim * itemsize          # x
                      + w_bytes                             # W1..W3
                      + (2 * hidden_dim + action_dim) * 4   # biases (f32)
                      + b_pad * action_dim * out_itemsize)  # out

    # Estimated per-step VMEM (double-buffered x/out + resident weights +
    # f32 intermediates).  Only raise the scoped limit when we get near v5e's
    # 16 MiB default; small/medium shapes never trigger this.
    vmem_est = (2 * tb * state_dim * itemsize
                + 2 * tb * action_dim * out_itemsize
                + w_bytes + (2 * hidden_dim + action_dim) * 4
                + 2 * tb * hidden_dim * 4)
    vmem_limit = None
    if vmem_est > 12 * 1024 * 1024:
        vmem_limit = int(min(2 * vmem_est, 64 * 1024 * 1024))

    out = pl.pallas_call(
        agent_net_kernel,
        out_shape=jax.ShapeDtypeStruct((b_pad, action_dim), out_dtype),
        grid_spec=pltpu.PrefetchScalarGridSpec(
            num_scalar_prefetch=0,
            grid=grid,
            in_specs=[
                # x: tiled over batch, true feature width (== full array dim).
                pl.BlockSpec((tb, state_dim), lambda i: (i, 0)),
                # Weights / biases: full arrays, constant index_map -> resident
                # in VMEM, not re-DMA'd per grid step.
                pl.BlockSpec((state_dim, hidden_dim), lambda i: (0, 0)),
                pl.BlockSpec((1, hidden_dim), lambda i: (0, 0)),
                pl.BlockSpec((hidden_dim, hidden_dim), lambda i: (0, 0)),
                pl.BlockSpec((1, hidden_dim), lambda i: (0, 0)),
                pl.BlockSpec((hidden_dim, action_dim), lambda i: (0, 0)),
                pl.BlockSpec((1, action_dim), lambda i: (0, 0)),
            ],
            out_specs=pl.BlockSpec((tb, action_dim), lambda i: (i, 0)),
        ),
        compiler_params=pltpu.CompilerParams(
            dimension_semantics=("parallel",),   # batch axis -> both TCs on v7x
            vmem_limit_bytes=vmem_limit),
        cost_estimate=pl.CostEstimate(
            flops=flops, transcendentals=0, bytes_accessed=bytes_accessed),
    )(x, w1, b1, w2, b2, w3, b3)

    return out[:batch] if b_pad != batch else out


def init_params(key, state_dim, hidden_dim, action_dim):
    """Deterministic init matching nn.Linear shapes (weights stored as (in, out))."""
    k1, k2, k3, k4, k5, k6 = jax.random.split(key, 6)

    def linear(kw, kb, fan_in, fan_out):
        bound = 1.0 / jnp.sqrt(jnp.float32(fan_in))
        w = jax.random.uniform(kw, (fan_in, fan_out), jnp.float32, -bound, bound)
        b = jax.random.uniform(kb, (1, fan_out), jnp.float32, -bound, bound)
        return w, b

    w1, b1 = linear(k1, k2, state_dim, hidden_dim)
    w2, b2 = linear(k3, k4, hidden_dim, hidden_dim)
    w3, b3 = linear(k5, k6, hidden_dim, action_dim)
    return (w1, b1, w2, b2, w3, b3)


def reference_forward(state, params):
    """Pure-JAX reference for correctness check."""
    w1, b1, w2, b2, w3, b3 = params
    h1 = jnp.maximum(state @ w1 + b1, 0.0)
    h2 = jnp.maximum(h1 @ w2 + b2, 0.0)
    return h2 @ w3 + b3


if __name__ == "__main__":
    # Small shapes consistent with the module's forward.
    batch, state_dim, hidden_dim, action_dim = 8, 16, 32, 8

    key = jax.random.PRNGKey(0)
    k_state, k_params = jax.random.split(key)

    state = jax.random.normal(k_state, (batch, state_dim), jnp.float32)
    params = init_params(k_params, state_dim, hidden_dim, action_dim)
    q_ref = reference_forward(state, params)

    # 1) f32 path, single batch tile — exact (up to fp roundoff).
    p_f32 = prepare_params(params, jnp.float32)
    q_f32 = jax.block_until_ready(agent_network_forward(state, p_f32))
    assert q_f32.shape == (batch, action_dim)
    assert jnp.allclose(q_f32, q_ref, atol=1e-5, rtol=1e-5)

    # 2) bf16 matmul-input path (recommended on v5e/v6e/v7x), f32 accumulate.
    #    Note: activations are cast to bf16 at each matmul input -> Q values
    #    match the f32 reference only to ~1e-1; fine for a DQN head.
    p_bf16 = prepare_params(params, jnp.bfloat16)
    q_bf16 = jax.block_until_ready(agent_network_forward(state, p_bf16))
    assert jnp.allclose(q_bf16.astype(jnp.float32), q_ref, atol=1e-1, rtol=1e-1)

    # 3) Exercise the batch-tiled grid (grid > 1) with a non-tile-multiple batch.
    state_big = jax.random.normal(k_state, (24, state_dim), jnp.float32)
    q_big = jax.block_until_ready(
        agent_network_forward(state_big, p_f32, block_batch=8))
    q_big_ref = reference_forward(state_big, params)
    assert q_big.shape == (24, action_dim)
    assert jnp.allclose(q_big, q_big_ref, atol=1e-5, rtol=1e-5)

    print("KERNEL_OK")
</pallas_src>

<mosaic_0001>
module attributes {stable_mosaic.version = 11 : i64} {
  func.func @agent_net_kernel(%arg0: i32, %arg1: memref<8x16xf32, #tpu.memory_space<vmem>>, %arg2: memref<16x32xf32, #tpu.memory_space<vmem>>, %arg3: memref<1x32xf32, #tpu.memory_space<vmem>>, %arg4: memref<32x32xf32, #tpu.memory_space<vmem>>, %arg5: memref<1x32xf32, #tpu.memory_space<vmem>>, %arg6: memref<32x8xf32, #tpu.memory_space<vmem>>, %arg7: memref<1x8xf32, #tpu.memory_space<vmem>>, %arg8: memref<8x8xf32, #tpu.memory_space<vmem>>) attributes {dimension_semantics = [#tpu.dimension_semantics<parallel>], iteration_bounds = array<i64: 1>, scalar_prefetch = 0 : i64, scratch_operands = 0 : i64, tpu.core_type = #tpu.core_type<tc>, window_params = [{transform_indices = @transform_0, window_bounds = array<i64: 8, 16>}, {pipeline_mode = #tpu.pipeline_mode<synchronous>, transform_indices = @transform_1, window_bounds = array<i64: 16, 32>}, {pipeline_mode = #tpu.pipeline_mode<synchronous>, transform_indices = @transform_2, window_bounds = array<i64: 1, 32>}, {pipeline_mode = #tpu.pipeline_mode<synchronous>, transform_indices = @transform_3, window_bounds = array<i64: 32, 32>}, {pipeline_mode = #tpu.pipeline_mode<synchronous>, transform_indices = @transform_4, window_bounds = array<i64: 1, 32>}, {pipeline_mode = #tpu.pipeline_mode<synchronous>, transform_indices = @transform_5, window_bounds = array<i64: 32, 8>}, {pipeline_mode = #tpu.pipeline_mode<synchronous>, transform_indices = @transform_6, window_bounds = array<i64: 1, 8>}, {transform_indices = @transform_7, window_bounds = array<i64: 8, 8>}]} {
    %c0 = arith.constant 0 : index
    %c0_0 = arith.constant 0 : index
    %0 = vector.load %arg1[%c0, %c0_0] : memref<8x16xf32, #tpu.memory_space<vmem>>, vector<8x16xf32>
    %c0_1 = arith.constant 0 : index
    %c0_2 = arith.constant 0 : index
    %1 = vector.load %arg2[%c0_1, %c0_2] : memref<16x32xf32, #tpu.memory_space<vmem>>, vector<16x32xf32>
    %cst = arith.constant dense<0.000000e+00> : vector<8x32xf32>
    %2 = tpu.matmul %0, %1, %cst {dimension_numbers = #tpu.dot_dimension_numbers<[1], [0], [0], [1], [0, 0, 1, 1], [], []>} : vector<8x16xf32>, vector<16x32xf32>, vector<8x32xf32> -> vector<8x32xf32>
    %c0_3 = arith.constant 0 : index
    %c0_4 = arith.constant 0 : index
    %3 = vector.load %arg3[%c0_3, %c0_4] : memref<1x32xf32, #tpu.memory_space<vmem>>, vector<1x32xf32>
    %4 = vector.broadcast %3 : vector<1x32xf32> to vector<8x32xf32>
    %5 = arith.addf %2, %4 : vector<8x32xf32>
    %cst_5 = arith.constant 0.000000e+00 : f32
    %6 = vector.broadcast %cst_5 : f32 to vector<8x32xf32>
    %7 = arith.maximumf %5, %6 : vector<8x32xf32>
    %c0_6 = arith.constant 0 : index
    %c0_7 = arith.constant 0 : index
    %8 = vector.load %arg4[%c0_6, %c0_7] : memref<32x32xf32, #tpu.memory_space<vmem>>, vector<32x32xf32>
    %cst_8 = arith.constant dense<0.000000e+00> : vector<8x32xf32>
    %9 = tpu.matmul %7, %8, %cst_8 {dimension_numbers = #tpu.dot_dimension_numbers<[1], [0], [0], [1], [0, 0, 1, 1], [], []>} : vector<8x32xf32>, vector<32x32xf32>, vector<8x32xf32> -> vector<8x32xf32>
    %c0_9 = arith.constant 0 : index
    %c0_10 = arith.constant 0 : index
    %10 = vector.load %arg5[%c0_9, %c0_10] : memref<1x32xf32, #tpu.memory_space<vmem>>, vector<1x32xf32>
    %11 = vector.broadcast %10 : vector<1x32xf32> to vector<8x32xf32>
    %12 = arith.addf %9, %11 : vector<8x32xf32>
    %cst_11 = arith.constant 0.000000e+00 : f32
    %13 = vector.broadcast %cst_11 : f32 to vector<8x32xf32>
    %14 = arith.maximumf %12, %13 : vector<8x32xf32>
    %c0_12 = arith.constant 0 : index
    %c0_13 = arith.constant 0 : index
    %15 = vector.load %arg6[%c0_12, %c0_13] : memref<32x8xf32, #tpu.memory_space<vmem>>, vector<32x8xf32>
    %cst_14 = arith.constant dense<0.000000e+00> : vector<8x8xf32>
    %16 = tpu.matmul %14, %15, %cst_14 {dimension_numbers = #tpu.dot_dimension_numbers<[1], [0], [0], [1], [0, 0, 1, 1], [], []>} : vector<8x32xf32>, vector<32x8xf32>, vector<8x8xf32> -> vector<8x8xf32>
    %c0_15 = arith.constant 0 : index
    %c0_16 = arith.constant 0 : index
    %17 = vector.load %arg7[%c0_15, %c0_16] : memref<1x8xf32, #tpu.memory_space<vmem>>, vector<1x8xf32>
    %18 = vector.broadcast %17 : vector<1x8xf32> to vector<8x8xf32>
    %19 = arith.addf %16, %18 : vector<8x8xf32>
    %c0_17 = arith.constant 0 : index
    %c0_18 = arith.constant 0 : index
    %20 = vector.load %arg8[%c0_17, %c0_18] : memref<8x8xf32, #tpu.memory_space<vmem>>, vector<8x8xf32>
    tpu.vector_store %arg8[%c0_17, %c0_18], %19 {strides = array<i32>} : memref<8x8xf32, #tpu.memory_space<vmem>>, vector<8x8xf32>,
    return
  }
  func.func @transform_0(%arg0: i32) -> (i32, i32) {
    %c0_i32 = arith.constant 0 : i32
    %c0_i32_0 = arith.constant 0 : i32
    return %arg0, %c0_i32 : i32, i32
  }
  func.func @transform_1(%arg0: i32) -> (i32, i32) {
    %c0_i32 = arith.constant 0 : i32
    %c0_i32_0 = arith.constant 0 : i32
    %c0_i32_1 = arith.constant 0 : i32
    return %c0_i32, %c0_i32_0 : i32, i32
  }
  func.func @transform_2(%arg0: i32) -> (i32, i32) {
    %c0_i32 = arith.constant 0 : i32
    %c0_i32_0 = arith.constant 0 : i32
    %c0_i32_1 = arith.constant 0 : i32
    return %c0_i32, %c0_i32_0 : i32, i32
  }
  func.func @transform_3(%arg0: i32) -> (i32, i32) {
    %c0_i32 = arith.constant 0 : i32
    %c0_i32_0 = arith.constant 0 : i32
    %c0_i32_1 = arith.constant 0 : i32
    return %c0_i32, %c0_i32_0 : i32, i32
  }
  func.func @transform_4(%arg0: i32) -> (i32, i32) {
    %c0_i32 = arith.constant 0 : i32
    %c0_i32_0 = arith.constant 0 : i32
    %c0_i32_1 = arith.constant 0 : i32
    return %c0_i32, %c0_i32_0 : i32, i32
  }
  func.func @transform_5(%arg0: i32) -> (i32, i32) {
    %c0_i32 = arith.constant 0 : i32
    %c0_i32_0 = arith.constant 0 : i32
    %c0_i32_1 = arith.constant 0 : i32
    return %c0_i32, %c0_i32_0 : i32, i32
  }
  func.func @transform_6(%arg0: i32) -> (i32, i32) {
    %c0_i32 = arith.constant 0 : i32
    %c0_i32_0 = arith.constant 0 : i32
    %c0_i32_1 = arith.constant 0 : i32
    return %c0_i32, %c0_i32_0 : i32, i32
  }
  func.func @transform_7(%arg0: i32) -> (i32, i32) {
    %c0_i32 = arith.constant 0 : i32
    %c0_i32_0 = arith.constant 0 : i32
    return %arg0, %c0_i32 : i32, i32
  }
}

</mosaic_0001>

<bundles_post_ra>
// kernel: tpu_custom_call.1
= control target key start
LH: loop header
LB: loop body
LE: loop exit
PB: predicated region body
PF: predicated region fallthrough
CT: control target
= control target key end

     0   :  { %12 = vsyncpa [#allocation3], 0  ;;  %s306_s0 = inlined_call_operand.vmem [shape: f32[8,16], index: 0, kind: input, shape index: {}]   ;;  %s307_s1 = inlined_call_operand.hbm [shape: f32[16,32], index: 1, kind: input, shape index: {}]   ;;  %s308_s2 = inlined_call_operand.vmem [shape: f32[1,32], index: 2, kind: input, shape index: {}]   ;;  %s309_s3 = inlined_call_operand.vmem [shape: f32[32,32], index: 3, kind: input, shape index: {}]   ;;  %s310_s4 = inlined_call_operand.vmem [shape: f32[1,32], index: 4, kind: input, shape index: {}]   ;;  %s311_s5 = inlined_call_operand.vmem [shape: f32[32,8], index: 5, kind: input, shape index: {}]   ;;  %s312_s6 = inlined_call_operand.vmem [shape: f32[1,8], index: 6, kind: input, shape index: {}]   ;;  %s313_s7 = inlined_call_operand.hbm [shape: f32[8,8], index: 7, kind: output, shape index: {}]  }
   0x1   :  { %13 = vsyncpa [#allocation4], 0  ;;  %s20_s26 = sshll.u32 %s307_s1, 4  ;;  %s220_s27 = smov [#allocation2]   ;;  %s21_s26 = int_to_ptr.hbm [resolvable:$true] %s20_s26 }
   0x2   :  { %s22_s28 = sshll.u32 %s220_s27, 4  ;;  %s221_s29 = smov 128   ;;  %s23_s28 = int_to_ptr.vmem [resolvable:$true] %s22_s28 }
   0x3   :  { %s222_s30 = smov 8  }
   0x4   :  { %28 = dma.hbm_to_vmem [thread:$0]  %s21_s26, 256, %s23_s28, [#allocation3], %s221_s29, %s221_s29, %s222_s30  }
   0x5   :  { %216 = dma.done.wait [#allocation3], 256  }
   0x6   :  { %217 = vsyncadd [#allocation3], 4294967040  ;;  %v45_v0 = vld [vmem:[#allocation2 + $0x8] sm:$0xff]  ;;  %v44_v1 = vld [vmem:[#allocation2] sm:$0xff]  ;;  %vm50_vm0 = vcmask 130048   ;;  %vm83_vm1 = vcmask 261120  }
   0x7   :  { %68 = vmatpush.msra.mxu0 %v45_v0  ;;  %v43_v2 = vld [vmem:[%s306_s0] sm:$0xff]  ;;  %v78_v3 = vld [vmem:[%s309_s3 + $0x18] sm:$0xff]  ;;  %v77_v4 = vld [vmem:[%s309_s3 + $0x10] sm:$0xff]  ;;  %s223_s28 = smov [#allocation5]   ;;  %s148_s9 = sshll.u32 %s313_s7, 4  ;;  %vm139_vm2 = vcmask 64512   ;;  %s149_s9 = int_to_ptr.hbm [resolvable:$true] %s148_s9 }
   0x8   :  { %99 = vmatpush.msra.mxu1 %v78_v3  ;;  %v76_v5 = vld [vmem:[%s309_s3 + $0x8] sm:$0xff]  ;;  %v75_v6 = vld [vmem:[%s309_s3] sm:$0xff]  ;;  %v111_v7 = vld [vmem:[%s311_s5 + $0x18] sm:$0xff]  ;;  %s146_s29 = sshll.u32 %s223_s28, 4  ;;  %s147_s29 = int_to_ptr.vmem [resolvable:$true] %s146_s29 }
   0x9   :  { %69 = vmatpush.msra.mxu0 %v44_v1  ;;  %131 = vmatpush.msra.mxu2 %v111_v7  ;;  %v165_v8 = vld [vmem:[%s308_s2] ss:$0 sm:$0xff]  ;;  %v110_v12 = vld [vmem:[%s311_s5 + $0x10] sm:$0xff]  ;;  %v109_v13 = vld [vmem:[%s311_s5 + $0x8] sm:$0xff] }
   0xa   :  { %158 = vmatmul.msk.f32.vlgmr.msra.gmra.mxu0 %vm50_vm0, %v43_v2  ;;  %100 = vmatpush.msra.mxu1 %v77_v4  ;;  %v108_v14 = vld [vmem:[%s311_s5] sm:$0xff] }
   0xb   :  { %132 = vmatpush.msra.mxu2 %v110_v12  ;;  %v166_v15 = vld [vmem:[%s310_s4] ss:$0 sm:$0xff] }
   0xc   :  { %101 = vmatpush.msra.mxu1 %v76_v5  ;;  %v167_v19 = vld [vmem:[%s312_s6] ss:$0 sm:$0xff] }
   0xd   :  { %133 = vmatpush.msra.mxu2 %v109_v13 }
   0xe   :  { %102 = vmatpush.msra.mxu1 %v75_v6 }
   0xf   :  { %134 = vmatpush.msra.mxu2 %v108_v14 }
  0x87   :  { %v71_v9 = vpop.f32.mrf.mxu0 }
  0x88   :  { %v72_v10 = vadd.f32 %v165_v8, %v71_v9 }
  0x8a   :  { %v74_v11 = vmax.f32 %v72_v10, 0.0 }
  0x8c   :  { %159 = vmatmul.msk.f32.vlgmr.msra.gmra.mxu1 %vm83_vm1, %v74_v11 }
 0x109   :  { %v104_v16 = vpop.f32.mrf.mxu1 }
 0x10a   :  { %v105_v17 = vadd.f32 %v166_v15, %v104_v16 }
 0x10c   :  { %v107_v18 = vmax.f32 %v105_v17, 0.0 }
 0x10e   :  { %160 = vmatmul.msk.f32.vlgmr.msra.gmra.mxu2 %vm83_vm1, %v107_v18 }
 0x191   :  { %v136_v20 = vpop.f32.mrf.mxu2 }
 0x192   :  { %v137_v21 = vadd.f32 %v167_v19, %v136_v20 }
 0x194   :  { %140 = vst.msk [vmem:[#allocation5] sm:$0xff] %vm139_vm2, %v137_v21 }
 0x195   :  { %151 = dma.vmem_to_hbm [thread:$0]  %s147_s29, 128, %s149_s9, [#allocation4]  }
 0x196   :  { %218 = dma.done.wait [#allocation4], 128  }
 0x197   :  { %219 = vsyncadd [#allocation4], 4294967168 }
 0x198   :  { %156 = vsyncpa [#allocation3], 1 }
 0x199   :  { %157 = vsyncpa [#allocation4], 1 }

</bundles_post_ra>
